<compile_context>
chip_gen: v7x
topology: tpu7x:2x2x1
jax: 0.10.0
libtpu: 0.0.40
codegen_flags: <defaults>
</compile_context>

<pallas_src>
import functools

import jax
import jax.numpy as jnp
from jax.experimental import pallas as pl
from jax.experimental.pallas import tpu as pltpu


def _round_up(x, m):
    return ((x + m - 1) // m) * m


def _cdiv(a, b):
    return (a + b - 1) // b


def _num_tensorcores():
    """Best-effort TensorCore count (2 on v7x, 1 on v5e/v6e). Falls back to 1."""
    try:
        info = pltpu.get_tpu_info()
        for attr in ("num_cores", "num_tensorcores", "tensorcores_per_chip",
                     "cores_per_chip"):
            n = getattr(info, attr, None)
            if isinstance(n, int) and n > 0:
                return n
    except Exception:
        pass
    try:
        n = getattr(jax.devices()[0], "num_cores", None)
        if isinstance(n, int) and n > 0:
            return n
    except Exception:
        pass
    return 1


def bc_mlp_kernel(x_ref, w1_ref, w2_ref, w3_ref, bias_ref, o_ref,
                  *, hidden_dim, action_pad, cast_inputs):
    """One batch tile of the 3-layer MLP. Weights are VMEM-resident."""
    H = hidden_dim
    w_dtype = w1_ref.dtype

    x = x_ref[...]                                   # [TB, S]
    b1 = bias_ref[0:1, :H]                           # [1, H]      (f32)
    b2 = bias_ref[1:2, :H]                           # [1, H]      (f32)
    b3 = bias_ref[2:3, :action_pad]                  # [1, A_pad]  (f32)

    # fc1 + ReLU (fp32 accumulation on the MXU)
    if cast_inputs:
        x = x.astype(w_dtype)
    h1 = jnp.dot(x, w1_ref[...], preferred_element_type=jnp.float32) + b1
    h1 = jnp.maximum(h1, 0.0)

    # fc2 + ReLU
    if cast_inputs:
        h1 = h1.astype(w_dtype)
    h2 = jnp.dot(h1, w2_ref[...], preferred_element_type=jnp.float32) + b2
    h2 = jnp.maximum(h2, 0.0)

    # fc3 + Tanh
    if cast_inputs:
        h2 = h2.astype(w_dtype)
    h3 = jnp.dot(h2, w3_ref[...], preferred_element_type=jnp.float32) + b3
    o_ref[...] = jnp.tanh(h3).astype(o_ref.dtype)


def init_bc_params(key, state_dim, action_dim, hidden_dim=128):
    """torch.nn.Linear-style init (uniform +/- 1/sqrt(fan_in)).
    Weights stored as [in_dim, out_dim] (transposed vs. torch's [out, in])."""
    ks = jax.random.split(key, 6)

    def linear(kw, kb, fan_in, fan_out):
        bound = 1.0 / jnp.sqrt(fan_in)
        w = jax.random.uniform(kw, (fan_in, fan_out), jnp.float32, -bound, bound)
        b = jax.random.uniform(kb, (fan_out,), jnp.float32, -bound, bound)
        return w, b

    w1, b1 = linear(ks[0], ks[1], state_dim, hidden_dim)
    w2, b2 = linear(ks[2], ks[3], hidden_dim, hidden_dim)
    w3, b3 = linear(ks[4], ks[5], hidden_dim, action_dim)
    return {"w1": w1, "b1": b1, "w2": w2, "b2": b2, "w3": w3, "b3": b3}


def prepare_params(params, compute_dtype=jnp.float32):
    """One-time layout prep:
      * pad w3/b3 to a 128-wide (lane-dense) output dim,
      * pack all three biases into a single (8, W) fp32 slab (one DMA),
      * pre-cast weights to compute_dtype (bf16 path: no in-kernel weight cast,
        half the weight DMA bytes; biases stay fp32 for the fp32-accum add)."""
    w1, b1 = params["w1"], params["b1"]
    w2, b2 = params["w2"], params["b2"]
    w3, b3 = params["w3"], params["b3"]
    H = w2.shape[0]
    A = w3.shape[1]
    A_pad = _round_up(A, 128)
    W = max(H, A_pad)

    w3p = jnp.zeros((H, A_pad), jnp.float32).at[:, :A].set(w3)
    bias = jnp.zeros((8, W), jnp.float32)
    bias = bias.at[0, :H].set(b1)
    bias = bias.at[1, :H].set(b2)
    bias = bias.at[2, :A].set(b3)

    return {
        "w1": w1.astype(compute_dtype),
        "w2": w2.astype(compute_dtype),
        "w3p": w3p.astype(compute_dtype),
        "bias": bias,                      # fp32
        "hidden_dim": H,
        "action_dim": A,
        "compute_dtype": jnp.dtype(compute_dtype),
    }


def bc_forward(state, prepared, *, max_batch_tile=1024, num_cores=None):
    """state: [B, state_dim] float32; prepared: output of prepare_params."""
    B, S = state.shape
    H = prepared["hidden_dim"]
    A = prepared["action_dim"]
    A_pad = prepared["w3p"].shape[1]
    bias = prepared["bias"]
    w_dtype = prepared["compute_dtype"]
    cast_inputs = w_dtype != jnp.dtype(jnp.float32)

    if num_cores is None:
        num_cores = _num_tensorcores()

    # Fewest balanced tiles covering the batch:
    #   * single-TC (v5e/v6e): 1 grid step when B <= max_batch_tile,
    #   * dual-TC (v7x): grid length is an even multiple of num_cores,
    # never padding up by more than one 8-row-aligned tile of waste.
    B8 = _round_up(B, 8)
    n_steps = num_cores * _cdiv(B8, num_cores * max_batch_tile)
    n_steps = max(1, min(n_steps, B8 // 8))
    tb = _round_up(_cdiv(B8, n_steps), 8)
    B_pad = n_steps * tb
    if B_pad != B:
        state = jnp.pad(state, ((0, B_pad - B), (0, 0)))

    kernel = functools.partial(
        bc_mlp_kernel, hidden_dim=H, action_pad=A_pad, cast_inputs=cast_inputs)

    itemsize = jnp.dtype(w_dtype).itemsize
    cost = pl.CostEstimate(
        flops=2 * B_pad * (S * H + H * H + H * A_pad),
        transcendentals=B_pad * A_pad,                     # tanh
        bytes_accessed=(state.size * 4                      # state in (f32)
                        + (S * H + H * H + H * A_pad) * itemsize  # weights
                        + bias.size * 4                      # packed biases
                        + B_pad * A_pad * 4))                # padded output

    out = pl.pallas_call(
        kernel,
        out_shape=jax.ShapeDtypeStruct((B_pad, A_pad), jnp.float32),
        grid=(n_steps,),
        in_specs=[
            pl.BlockSpec((tb, S), lambda i: (i, 0)),             # state tile
            pl.BlockSpec((S, H), lambda i: (0, 0)),              # w1 (resident)
            pl.BlockSpec((H, H), lambda i: (0, 0)),              # w2 (resident)
            pl.BlockSpec((H, A_pad), lambda i: (0, 0)),          # w3 padded
            pl.BlockSpec(bias.shape, lambda i: (0, 0)),          # packed biases
        ],
        out_specs=pl.BlockSpec((tb, A_pad), lambda i: (i, 0)),   # lane-dense out
        compiler_params=pltpu.CompilerParams(
            dimension_semantics=("parallel",)),
        cost_estimate=cost,
    )(state, prepared["w1"], prepared["w2"], prepared["w3p"], bias)

    return out[:B, :A]


if __name__ == "__main__":
    key = jax.random.PRNGKey(0)
    k_param, k_state = jax.random.split(key)

    state_dim, action_dim, hidden_dim = 16, 8, 128
    B = 256  # batched states per call (amortizes launch + weight DMA)

    raw = init_bc_params(k_param, state_dim, action_dim, hidden_dim)
    state = jax.random.normal(k_state, (B, state_dim), dtype=jnp.float32)

    # Pure-JAX reference.
    def ref_fn(x):
        h = jnp.maximum(x @ raw["w1"] + raw["b1"], 0.0)
        h = jnp.maximum(h @ raw["w2"] + raw["b2"], 0.0)
        return jnp.tanh(h @ raw["w3"] + raw["b3"])

    ref = ref_fn(state)

    # fp32 path (default): no cast ops emitted at all.
    prepared_f32 = prepare_params(raw)
    action = bc_forward(state, prepared_f32)
    jax.block_until_ready(action)
    assert action.shape == (B, action_dim)
    assert jnp.allclose(action, ref, atol=1e-5, rtol=1e-5)

    # Small ragged batch exercises the padding / tile-selection path.
    small = state[:8]
    small_out = bc_forward(small, prepared_f32)
    jax.block_until_ready(small_out)
    assert jnp.allclose(small_out, ref_fn(small), atol=1e-5, rtol=1e-5)

    # bf16 matmul-operand path (v6e/v7x MXU-native), weights pre-cast once,
    # fp32 accumulation kept.
    prepared_bf16 = prepare_params(raw, compute_dtype=jnp.bfloat16)
    action_bf16 = bc_forward(state, prepared_bf16)
    jax.block_until_ready(action_bf16)
    assert jnp.allclose(action_bf16, ref, atol=3e-2, rtol=3e-2)

    print("KERNEL_OK")
</pallas_src>

<mosaic_0001>
module attributes {stable_mosaic.version = 11 : i64} {
  func.func @bc_mlp_kernel(%arg0: i32, %arg1: memref<256x16xf32, #tpu.memory_space<vmem>>, %arg2: memref<16x128xf32, #tpu.memory_space<vmem>>, %arg3: memref<128x128xf32, #tpu.memory_space<vmem>>, %arg4: memref<128x128xf32, #tpu.memory_space<vmem>>, %arg5: memref<8x128xf32, #tpu.memory_space<vmem>>, %arg6: memref<256x128xf32, #tpu.memory_space<vmem>>) attributes {dimension_semantics = [#tpu.dimension_semantics<parallel>], iteration_bounds = array<i64: 1>, scalar_prefetch = 0 : i64, scratch_operands = 0 : i64, tpu.core_type = #tpu.core_type<tc>, window_params = [{transform_indices = @transform_0, window_bounds = array<i64: 256, 16>}, {pipeline_mode = #tpu.pipeline_mode<synchronous>, transform_indices = @transform_1, window_bounds = array<i64: 16, 128>}, {pipeline_mode = #tpu.pipeline_mode<synchronous>, transform_indices = @transform_2, window_bounds = array<i64: 128, 128>}, {pipeline_mode = #tpu.pipeline_mode<synchronous>, transform_indices = @transform_3, window_bounds = array<i64: 128, 128>}, {pipeline_mode = #tpu.pipeline_mode<synchronous>, transform_indices = @transform_4, window_bounds = array<i64: 8, 128>}, {transform_indices = @transform_5, window_bounds = array<i64: 256, 128>}]} {
    %c0 = arith.constant 0 : index
    %c0_0 = arith.constant 0 : index
    %0 = vector.load %arg1[%c0, %c0_0] : memref<256x16xf32, #tpu.memory_space<vmem>>, vector<256x16xf32>
    %c0_1 = arith.constant 0 : index
    %c0_2 = arith.constant 0 : index
    %1 = vector.load %arg5[%c0_1, %c0_2] : memref<8x128xf32, #tpu.memory_space<vmem>>, vector<1x128xf32>
    %c1 = arith.constant 1 : index
    %c0_3 = arith.constant 0 : index
    %2 = vector.load %arg5[%c1, %c0_3] : memref<8x128xf32, #tpu.memory_space<vmem>>, vector<1x128xf32>
    %c2 = arith.constant 2 : index
    %c0_4 = arith.constant 0 : index
    %3 = vector.load %arg5[%c2, %c0_4] : memref<8x128xf32, #tpu.memory_space<vmem>>, vector<1x128xf32>
    %c0_5 = arith.constant 0 : index
    %c0_6 = arith.constant 0 : index
    %4 = vector.load %arg2[%c0_5, %c0_6] : memref<16x128xf32, #tpu.memory_space<vmem>>, vector<16x128xf32>
    %cst = arith.constant dense<0.000000e+00> : vector<256x128xf32>
    %5 = tpu.matmul %0, %4, %cst {dimension_numbers = #tpu.dot_dimension_numbers<[1], [0], [0], [1], [0, 0, 1, 1], [], []>} : vector<256x16xf32>, vector<16x128xf32>, vector<256x128xf32> -> vector<256x128xf32>
    %6 = vector.broadcast %1 : vector<1x128xf32> to vector<256x128xf32>
    %7 = arith.addf %5, %6 : vector<256x128xf32>
    %cst_7 = arith.constant 0.000000e+00 : f32
    %8 = vector.broadcast %cst_7 : f32 to vector<256x128xf32>
    %9 = arith.maximumf %7, %8 : vector<256x128xf32>
    %c0_8 = arith.constant 0 : index
    %c0_9 = arith.constant 0 : index
    %10 = vector.load %arg3[%c0_8, %c0_9] : memref<128x128xf32, #tpu.memory_space<vmem>>, vector<128x128xf32>
    %cst_10 = arith.constant dense<0.000000e+00> : vector<256x128xf32>
    %11 = tpu.matmul %9, %10, %cst_10 {dimension_numbers = #tpu.dot_dimension_numbers<[1], [0], [0], [1], [0, 0, 1, 1], [], []>} : vector<256x128xf32>, vector<128x128xf32>, vector<256x128xf32> -> vector<256x128xf32>
    %12 = vector.broadcast %2 : vector<1x128xf32> to vector<256x128xf32>
    %13 = arith.addf %11, %12 : vector<256x128xf32>
    %cst_11 = arith.constant 0.000000e+00 : f32
    %14 = vector.broadcast %cst_11 : f32 to vector<256x128xf32>
    %15 = arith.maximumf %13, %14 : vector<256x128xf32>
    %c0_12 = arith.constant 0 : index
    %c0_13 = arith.constant 0 : index
    %16 = vector.load %arg4[%c0_12, %c0_13] : memref<128x128xf32, #tpu.memory_space<vmem>>, vector<128x128xf32>
    %cst_14 = arith.constant dense<0.000000e+00> : vector<256x128xf32>
    %17 = tpu.matmul %15, %16, %cst_14 {dimension_numbers = #tpu.dot_dimension_numbers<[1], [0], [0], [1], [0, 0, 1, 1], [], []>} : vector<256x128xf32>, vector<128x128xf32>, vector<256x128xf32> -> vector<256x128xf32>
    %18 = vector.broadcast %3 : vector<1x128xf32> to vector<256x128xf32>
    %19 = arith.addf %17, %18 : vector<256x128xf32>
    %20 = math.tanh %19 : vector<256x128xf32>
    %c0_15 = arith.constant 0 : index
    %c0_16 = arith.constant 0 : index
    %21 = vector.load %arg6[%c0_15, %c0_16] : memref<256x128xf32, #tpu.memory_space<vmem>>, vector<256x128xf32>
    tpu.vector_store %arg6[%c0_15, %c0_16], %20 {strides = array<i32>} : memref<256x128xf32, #tpu.memory_space<vmem>>, vector<256x128xf32>,
    return
  }
  func.func @transform_0(%arg0: i32) -> (i32, i32) {
    %c0_i32 = arith.constant 0 : i32
    %c0_i32_0 = arith.constant 0 : i32
    return %arg0, %c0_i32 : i32, i32
  }
  func.func @transform_1(%arg0: i32) -> (i32, i32) {
    %c0_i32 = arith.constant 0 : i32
    %c0_i32_0 = arith.constant 0 : i32
    %c0_i32_1 = arith.constant 0 : i32
    return %c0_i32, %c0_i32_0 : i32, i32
  }
  func.func @transform_2(%arg0: i32) -> (i32, i32) {
    %c0_i32 = arith.constant 0 : i32
    %c0_i32_0 = arith.constant 0 : i32
    %c0_i32_1 = arith.constant 0 : i32
    return %c0_i32, %c0_i32_0 : i32, i32
  }
  func.func @transform_3(%arg0: i32) -> (i32, i32) {
    %c0_i32 = arith.constant 0 : i32
    %c0_i32_0 = arith.constant 0 : i32
    %c0_i32_1 = arith.constant 0 : i32
    return %c0_i32, %c0_i32_0 : i32, i32
  }
  func.func @transform_4(%arg0: i32) -> (i32, i32) {
    %c0_i32 = arith.constant 0 : i32
    %c0_i32_0 = arith.constant 0 : i32
    %c0_i32_1 = arith.constant 0 : i32
    return %c0_i32, %c0_i32_0 : i32, i32
  }
  func.func @transform_5(%arg0: i32) -> (i32, i32) {
    %c0_i32 = arith.constant 0 : i32
    %c0_i32_0 = arith.constant 0 : i32
    return %arg0, %c0_i32 : i32, i32
  }
}

</mosaic_0001>

<bundles_post_ra>
// kernel: tpu_custom_call.1
= control target key start
LH: loop header
LB: loop body
LE: loop exit
PB: predicated region body
PF: predicated region fallthrough
CT: control target
= control target key end

     0   :  { %vm62_vm0 = vcmask 130048   ;;  %s1963_s0 = inlined_call_operand.vmem [shape: f32[256,16], index: 0, kind: input, shape index: {}]   ;;  %s1964_s1 = inlined_call_operand.vmem [shape: f32[16,128], index: 1, kind: input, shape index: {}]   ;;  %s1965_s2 = inlined_call_operand.vmem [shape: f32[128,128], index: 2, kind: input, shape index: {}]   ;;  %s1966_s3 = inlined_call_operand.vmem [shape: f32[128,128], index: 3, kind: input, shape index: {}]   ;;  %s1967_s4 = inlined_call_operand.vmem [shape: f32[8,128], index: 4, kind: input, shape index: {}]   ;;  %s1968_s5 = inlined_call_operand.hbm [shape: f32[256,128], index: 5, kind: output, shape index: {}]  }
   0x1   :  { %v56_v0 = vld [vmem:[%s1964_s1] sm:$0xff]  ;;  %v57_v1 = vld [vmem:[%s1964_s1 + $0x8] sm:$0xff]  ;;  %v23_v5 = vld [vmem:[%s1963_s0 + $0x10] sm:$0xff] }
   0x2   :  { %v21_v2 = vld [vmem:[%s1963_s0] sm:$0xff]  ;;  %v1395_v3 = vpack.c.bf16 %v57_v1, %v56_v0  ;;  %v22_v4 = vld [vmem:[%s1963_s0 + $0x8] sm:$0xff]  ;;  %v39_v8 = vld [vmem:[%s1963_s0 + $0x90] sm:$0xff] }
   0x3   :  { %1187 = vmatprep.mubr.msk.f32.mxu0 %vm62_vm0, %v21_v2  ;;  %v37_v6 = vld [vmem:[%s1963_s0 + $0x80] sm:$0xff]  ;;  %v38_v7 = vld [vmem:[%s1963_s0 + $0x88] sm:$0xff]  ;;  %v24_v9 = vld [vmem:[%s1963_s0 + $0x18] sm:$0xff] }
   0x4   :  { %1396 = vmatprep.subr.bf16.mxu0 %v1395_v3  ;;  %1463 = vmatprep.subr.bf16.mxu1 %v1395_v3  ;;  %v25_v10 = vld [vmem:[%s1963_s0 + $0x20] sm:$0xff]  ;;  %v40_v11 = vld [vmem:[%s1963_s0 + $0x98] sm:$0xff]  ;;  %v417_v14 = vld [vmem:[%s1965_s2 + $0x8] sm:$0xff] }
   0x5   :  { %1398 = vmatpush3.bf16.msra.mxu0 %v1395_v3  ;;  %1464 = vmatpush3.bf16.msra.mxu1 %v1395_v3  ;;  %v41_v12 = vld [vmem:[%s1963_s0 + $0xa0] sm:$0xff]  ;;  %v26_v15 = vld [vmem:[%s1963_s0 + $0x28] sm:$0xff]  ;;  %v418_v17 = vld [vmem:[%s1965_s2 + $0x10] sm:$0xff] }
   0x6   :  { %1211 = vmatprep.mubr.msk.f32.mxu1 %vm62_vm0, %v37_v6  ;;  %v416_v13 = vld [vmem:[%s1965_s2] sm:$0xff]  ;;  %v419_v18 = vld [vmem:[%s1965_s2 + $0x18] sm:$0xff]  ;;  %v27_v19 = vld [vmem:[%s1963_s0 + $0x30] sm:$0xff] }
   0x7   :  { %v1399_v16 = vpack.c.bf16 %v417_v14, %v416_v13  ;;  %v42_v20 = vld [vmem:[%s1963_s0 + $0xa8] sm:$0xff]  ;;  %v1403_v21 = vpack.c.bf16 %v419_v18, %v418_v17  ;;  %v43_v22 = vld [vmem:[%s1963_s0 + $0xb0] sm:$0xff]  ;;  %v420_v23 = vld [vmem:[%s1965_s2 + $0x20] sm:$0xff] }
   0x8   :  { %1188 = vmatmul.mubr.msk.f32.vlgmr.msra.gmra.mrb[0].mxu0 %vm62_vm0, %v22_v4  ;;  %1212 = vmatmul.mubr.msk.f32.vlgmr.msra.gmra.mrb[0].mxu1 %vm62_vm0, %v38_v7  ;;  %v421_v24 = vld [vmem:[%s1965_s2 + $0x28] sm:$0xff]  ;;  %v28_v25 = vld [vmem:[%s1963_s0 + $0x38] sm:$0xff] }
   0x9   :  { %1190 = vmatprep.mubr.msk.f32.mxu0 %vm62_vm0, %v23_v5  ;;  %1214 = vmatprep.mubr.msk.f32.mxu1 %vm62_vm0, %v39_v8 }
   0xa   :  { %1400 = vmatprep.subr.bf16.mxu1 %v1399_v16 }
   0xb   :  { %1402 = vmatpush3.bf16.msra.mxu1 %v1399_v16 }
   0xc   :  { %1191 = vmatmul.mubr.msk.f32.gmra.mrb[2].mxu0 %vm62_vm0, %v24_v9  ;;  %1215 = vmatmul.mubr.msk.f32.gmra.mrb[2].mxu1 %vm62_vm0, %v40_v11 }
   0xd   :  { %1193 = vmatprep.mubr.msk.f32.mxu0 %vm62_vm0, %v25_v10  ;;  %1217 = vmatprep.mubr.msk.f32.mxu1 %vm62_vm0, %v41_v12 }
  0x10   :  { %1194 = vmatmul.mubr.msk.f32.gmra.mrb[4].mxu0 %vm62_vm0, %v26_v15  ;;  %1218 = vmatmul.mubr.msk.f32.gmra.mrb[4].mxu1 %vm62_vm0, %v42_v20 }
  0x11   :  { %1196 = vmatprep.mubr.msk.f32.mxu0 %vm62_vm0, %v27_v19 }
  0x12   :  { %10 = vsyncpa [#allocation3], 0  ;;  %v29_v26 = vld [vmem:[%s1963_s0 + $0x40] sm:$0xff]  ;;  %1220 = vmatprep.mubr.msk.f32.mxu1 %vm62_vm0, %v43_v22  ;;  %v44_v27 = vld [vmem:[%s1963_s0 + $0xb8] sm:$0xff]  ;;  %1404 = vmatprep.subr.bf16.mxu1 %v1403_v21  ;;  %v1407_v28 = vpack.c.bf16 %v421_v24, %v420_v23 }
  0x13   :  { %v45_v29 = vld [vmem:[%s1963_s0 + $0xc0] sm:$0xff]  ;;  %v422_v30 = vld [vmem:[%s1965_s2 + $0x30] sm:$0xff]  ;;  %v423_v31 = vld [vmem:[%s1965_s2 + $0x38] sm:$0xff]  ;;  %1406 = vmatpush3.bf16.msra.mxu1 %v1403_v21 }
  0x14   :  { %1197 = vmatmul.mubr.msk.f32.gmra.mrb[6].mxu0 %vm62_vm0, %v28_v25  ;;  %v30_v32 = vld [vmem:[%s1963_s0 + $0x48] sm:$0xff]  ;;  %1221 = vmatmul.mubr.msk.f32.gmra.mrb[6].mxu1 %vm62_vm0, %v44_v27  ;;  %v31_v33 = vld [vmem:[%s1963_s0 + $0x50] sm:$0xff]  ;;  %v1411_v35 = vpack.c.bf16 %v423_v31, %v422_v30  ;;  %v424_v37 = vld [vmem:[%s1965_s2 + $0x40] sm:$0xff] }
  0x15   :  { %1199 = vmatprep.mubr.msk.f32.mxu0 %vm62_vm0, %v29_v26  ;;  %1223 = vmatprep.mubr.msk.f32.mxu1 %vm62_vm0, %v45_v29  ;;  %v46_v34 = vld [vmem:[%s1963_s0 + $0xc8] sm:$0xff]  ;;  %v47_v36 = vld [vmem:[%s1963_s0 + $0xd0] sm:$0xff]  ;;  %v32_v39 = vld [vmem:[%s1963_s0 + $0x58] sm:$0xff] }
  0x16   :  { %1408 = vmatprep.subr.bf16.mxu1 %v1407_v28  ;;  %v425_v38 = vld [vmem:[%s1965_s2 + $0x48] sm:$0xff]  ;;  %v33_v40 = vld [vmem:[%s1963_s0 + $0x60] sm:$0xff]  ;;  %v48_v41 = vld [vmem:[%s1963_s0 + $0xd8] sm:$0xff] }
  0x17   :  { %1410 = vmatpush3.bf16.msra.mxu1 %v1407_v28  ;;  %v1415_v42 = vpack.c.bf16 %v425_v38, %v424_v37  ;;  %v49_v43 = vld [vmem:[%s1963_s0 + $0xe0] sm:$0xff]  ;;  %v426_v44 = vld [vmem:[%s1965_s2 + $0x50] sm:$0xff]  ;;  %v427_v45 = vld [vmem:[%s1965_s2 + $0x58] sm:$0xff] }
  0x18   :  { %1200 = vmatmul.mubr.msk.f32.gmra.mrb[8].mxu0 %vm62_vm0, %v30_v32  ;;  %1224 = vmatmul.mubr.msk.f32.gmra.mrb[8].mxu1 %vm62_vm0, %v46_v34  ;;  %v34_v46 = vld [vmem:[%s1963_s0 + $0x68] sm:$0xff]  ;;  %v35_v47 = vld [vmem:[%s1963_s0 + $0x70] sm:$0xff]  ;;  %v1419_v49 = vpack.c.bf16 %v427_v45, %v426_v44  ;;  %v428_v50 = vld [vmem:[%s1965_s2 + $0x60] sm:$0xff] }
  0x19   :  { %1202 = vmatprep.mubr.msk.f32.mxu0 %vm62_vm0, %v31_v33  ;;  %1226 = vmatprep.mubr.msk.f32.mxu1 %vm62_vm0, %v47_v36  ;;  %v50_v48 = vld [vmem:[%s1963_s0 + $0xe8] sm:$0xff]  ;;  %v51_v52 = vld [vmem:[%s1963_s0 + $0xf0] sm:$0xff]  ;;  %v36_v53 = vld [vmem:[%s1963_s0 + $0x78] sm:$0xff] }
  0x1a   :  { %1412 = vmatprep.subr.bf16.mxu1 %v1411_v35  ;;  %v429_v51 = vld [vmem:[%s1965_s2 + $0x68] sm:$0xff]  ;;  %v52_v55 = vld [vmem:[%s1963_s0 + $0xf8] sm:$0xff]  ;;  %v430_v56 = vld [vmem:[%s1965_s2 + $0x70] sm:$0xff] }
  0x1b   :  { %1414 = vmatpush3.bf16.msra.mxu1 %v1411_v35  ;;  %v1423_v54 = vpack.c.bf16 %v429_v51, %v428_v50  ;;  %v431_v57 = vld [vmem:[%s1965_s2 + $0x78] sm:$0xff]  ;;  %v693_v59 = vld [vmem:[%s1966_s3] sm:$0xff]  ;;  %v694_v60 = vld [vmem:[%s1966_s3 + $0x8] sm:$0xff] }
  0x1c   :  { %1203 = vmatmul.mubr.msk.f32.gmra.mrb[10].mxu0 %vm62_vm0, %v32_v39  ;;  %1227 = vmatmul.mubr.msk.f32.gmra.mrb[10].mxu1 %vm62_vm0, %v48_v41  ;;  %v1427_v58 = vpack.c.bf16 %v431_v57, %v430_v56  ;;  %v695_v61 = vld [vmem:[%s1966_s3 + $0x10] sm:$0xff]  ;;  %v1431_v62 = vpack.c.bf16 %v694_v60, %v693_v59  ;;  %v696_v63 = vld [vmem:[%s1966_s3 + $0x18] sm:$0xff]  ;;  %v697_v1 = vld [vmem:[%s1966_s3 + $0x20] sm:$0xff] }
  0x1d   :  { %1205 = vmatprep.mubr.msk.f32.mxu0 %vm62_vm0, %v33_v40  ;;  %1229 = vmatprep.mubr.msk.f32.mxu1 %vm62_vm0, %v49_v43  ;;  %v1435_v0 = vpack.c.bf16 %v696_v63, %v695_v61  ;;  %v698_v2 = vld [vmem:[%s1966_s3 + $0x28] sm:$0xff]  ;;  %v699_v4 = vld [vmem:[%s1966_s3 + $0x30] sm:$0xff]  ;;  %v700_v5 = vld [vmem:[%s1966_s3 + $0x38] sm:$0xff] }
  0x1e   :  { %1416 = vmatprep.subr.bf16.mxu1 %v1415_v42  ;;  %1432 = vmatprep.subr.bf16.mxu0 %v1431_v62  ;;  %v1439_v3 = vpack.c.bf16 %v698_v2, %v697_v1  ;;  %v1443_v6 = vpack.c.bf16 %v700_v5, %v699_v4  ;;  %v701_v7 = vld [vmem:[%s1966_s3 + $0x40] sm:$0xff]  ;;  %v702_v8 = vld [vmem:[%s1966_s3 + $0x48] sm:$0xff]  ;;  %v703_v10 = vld [vmem:[%s1966_s3 + $0x50] sm:$0xff] }
  0x1f   :  { %1418 = vmatpush3.bf16.msra.mxu1 %v1415_v42  ;;  %1434 = vmatpush3.bf16.msra.mxu0 %v1431_v62  ;;  %v1447_v9 = vpack.c.bf16 %v702_v8, %v701_v7  ;;  %v704_v11 = vld [vmem:[%s1966_s3 + $0x58] sm:$0xff]  ;;  %v705_v13 = vld [vmem:[%s1966_s3 + $0x60] sm:$0xff]  ;;  %v706_v14 = vld [vmem:[%s1966_s3 + $0x68] sm:$0xff] }
  0x20   :  { %1206 = vmatmul.mubr.msk.f32.gmra.mrb[12].mxu0 %vm62_vm0, %v34_v46  ;;  %1230 = vmatmul.mubr.msk.f32.gmra.mrb[12].mxu1 %vm62_vm0, %v50_v48  ;;  %v1451_v12 = vpack.c.bf16 %v704_v11, %v703_v10  ;;  %v1455_v15 = vpack.c.bf16 %v706_v14, %v705_v13  ;;  %v1816_v16 = vld [vmem:[%s1967_s4] ss:$0 sm:$0xff] }
  0x21   :  { %1208 = vmatprep.mubr.msk.f32.mxu0 %vm62_vm0, %v35_v47  ;;  %1232 = vmatprep.mubr.msk.f32.mxu1 %vm62_vm0, %v51_v52 }
  0x22   :  { %1420 = vmatprep.subr.bf16.mxu1 %v1419_v49  ;;  %1436 = vmatprep.subr.bf16.mxu0 %v1435_v0 }
  0x23   :  { %1422 = vmatpush3.bf16.msra.mxu1 %v1419_v49  ;;  %1438 = vmatpush3.bf16.msra.mxu0 %v1435_v0 }
  0x24   :  { %1209 = vmatmul.mubr.msk.f32.gmra.mrb[14].mxu0 %vm62_vm0, %v36_v53  ;;  %1233 = vmatmul.mubr.msk.f32.gmra.mrb[14].mxu1 %vm62_vm0, %v52_v55 }
  0x25   :  { %1424 = vmatprep.subr.bf16.mxu1 %v1423_v54  ;;  %1440 = vmatprep.subr.bf16.mxu0 %v1439_v3 }
  0x27   :  { %1426 = vmatpush3.bf16.msra.mxu1 %v1423_v54  ;;  %1442 = vmatpush3.bf16.msra.mxu0 %v1439_v3 }
  0x28   :  { %1428 = vmatprep.subr.bf16.mxu1 %v1427_v58  ;;  %1444 = vmatprep.subr.bf16.mxu0 %v1443_v6 }
  0x2b   :  { %1430 = vmatpush3.bf16.msra.mxu1 %v1427_v58  ;;  %1446 = vmatpush3.bf16.msra.mxu0 %v1443_v6 }
  0x2c   :  { %1448 = vmatprep.subr.bf16.mxu0 %v1447_v9 }
  0x2f   :  { %1450 = vmatpush3.bf16.msra.mxu0 %v1447_v9 }
  0x30   :  { %1452 = vmatprep.subr.bf16.mxu0 %v1451_v12 }
  0x33   :  { %1454 = vmatpush3.bf16.msra.mxu0 %v1451_v12 }
  0x34   :  { %1456 = vmatprep.subr.bf16.mxu0 %v1455_v15 }
  0x37   :  { %1458 = vmatpush3.bf16.msra.mxu0 %v1455_v15 }
  0xdb   :  { %v1189_v17 = vpop.f32.mrb[0].mxu0  ;;  %v1819_v20 = vpop.f32.mrb[0].mxu1 }
  0xdc   :  { %v231_v18 = vadd.f32 %v1189_v17, %v1816_v16  ;;  %v225_v19 = vpop.f32.mrb[1].mxu0  ;;  %v1822_v22 = vpop.f32.mrb[1].mxu1 }
  0xdd   :  { %v226_v21 = vadd.f32 %v1816_v16, %v225_v19  ;;  %v306_v9 = vadd.f32 %v1816_v16, %v1822_v22 }
  0xde   :  { %v385_v25 = vmax.f32 %v231_v18, 0.0 }
  0xdf   :  { %v384_v23 = vmax.f32 %v226_v21, 0.0  ;;  %v1192_v24 = vpop.f32.mrb[2].mxu0  ;;  %v1825_v28 = vpop.f32.mrb[2].mxu1  ;;  %v400_v18 = vmax.f32 %v306_v9, 0.0 }
  0xe0   :  { %v241_v26 = vadd.f32 %v1192_v24, %v1816_v16  ;;  %v235_v27 = vpop.f32.mrb[3].mxu0  ;;  %v1828_v30 = vpop.f32.mrb[3].mxu1 }
  0xe1   :  { %v236_v29 = vadd.f32 %v1816_v16, %v235_v27  ;;  %1267 = vmatprep.mubr.f32.mxu1 %v384_v23  ;;  %v316_v19 = vadd.f32 %v1816_v16, %v1828_v30  ;;  %v311_v23 = vadd.f32 %v1819_v20, %v1816_v16 }
  0xe2   :  { %1268 = vmatmul.mubr.f32.vlgmr.msra.gmra.mrb[16].mxu1 %v385_v25  ;;  %v387_v33 = vmax.f32 %v241_v26, 0.0  ;;  %v321_v26 = vadd.f32 %v1825_v28, %v1816_v16 }
  0xe3   :  { %v386_v31 = vmax.f32 %v236_v29, 0.0  ;;  %v1195_v32 = vpop.f32.mrb[4].mxu0  ;;  %v1831_v36 = vpop.f32.mrb[4].mxu1  ;;  %v402_v22 = vmax.f32 %v316_v19, 0.0  ;;  %v401_v25 = vmax.f32 %v311_v23, 0.0 }
  0xe4   :  { %v251_v34 = vadd.f32 %v1195_v32, %v1816_v16  ;;  %v245_v35 = vpop.f32.mrb[5].mxu0  ;;  %v325_v38 = vpop.f32.mrb[5].mxu1  ;;  %v403_v30 = vmax.f32 %v321_v26, 0.0 }
  0xe5   :  { %v246_v37 = vadd.f32 %v1816_v16, %v245_v35  ;;  %1270 = vmatprep.mubr.f32.mxu1 %v386_v31  ;;  %v326_v24 = vadd.f32 %v1816_v16, %v325_v38  ;;  %v331_v31 = vadd.f32 %v1831_v36, %v1816_v16 }
  0xe6   :  { %1271 = vmatmul.mubr.f32.gmra.mrb[18].mxu1 %v387_v33  ;;  %v389_v41 = vmax.f32 %v251_v34, 0.0 }
  0xe7   :  { %v388_v39 = vmax.f32 %v246_v37, 0.0  ;;  %v1198_v40 = vpop.f32.mrb[6].mxu0  ;;  %v1835_v44 = vpop.f32.mrb[6].mxu1  ;;  %v404_v27 = vmax.f32 %v326_v24, 0.0  ;;  %v405_v33 = vmax.f32 %v331_v31, 0.0 }
  0xe8   :  { %v261_v42 = vadd.f32 %v1198_v40, %v1816_v16  ;;  %v255_v43 = vpop.f32.mrb[7].mxu0  ;;  %v335_v46 = vpop.f32.mrb[7].mxu1  ;;  %v341_v34 = vadd.f32 %v1835_v44, %v1816_v16 }
  0xe9   :  { %v256_v45 = vadd.f32 %v1816_v16, %v255_v43  ;;  %1273 = vmatprep.mubr.f32.mxu1 %v388_v39  ;;  %v336_v29 = vadd.f32 %v1816_v16, %v335_v46 }
  0xea   :  { %1274 = vmatmul.mubr.f32.gmra.mrb[20].mxu1 %v389_v41  ;;  %v391_v49 = vmax.f32 %v261_v42, 0.0  ;;  %v407_v37 = vmax.f32 %v341_v34, 0.0 }
  0xeb   :  { %v390_v47 = vmax.f32 %v256_v45, 0.0  ;;  %v1201_v48 = vpop.f32.mrb[8].mxu0  ;;  %v1839_v52 = vpop.f32.mrb[8].mxu1  ;;  %v406_v20 = vmax.f32 %v336_v29, 0.0 }
  0xec   :  { %v271_v50 = vadd.f32 %v1201_v48, %v1816_v16  ;;  %v265_v51 = vpop.f32.mrb[9].mxu0  ;;  %v345_v54 = vpop.f32.mrb[9].mxu1  ;;  %v351_v38 = vadd.f32 %v1839_v52, %v1816_v16 }
  0xed   :  { %v266_v53 = vadd.f32 %v1816_v16, %v265_v51  ;;  %1276 = vmatprep.mubr.f32.mxu1 %v390_v47  ;;  %v346_v32 = vadd.f32 %v1816_v16, %v345_v54  ;;  %v708_v51 = vld [vmem:[%s1966_s3 + $0x78] sm:$0xff] }
  0xee   :  { %1277 = vmatmul.mubr.f32.gmra.mrb[22].mxu1 %v391_v49  ;;  %v393_v57 = vmax.f32 %v271_v50, 0.0  ;;  %v409_v40 = vmax.f32 %v351_v38, 0.0  ;;  %v707_v50 = vld [vmem:[%s1966_s3 + $0x70] sm:$0xff] }
  0xef   :  { %v392_v55 = vmax.f32 %v266_v53, 0.0  ;;  %v1204_v56 = vpop.f32.mrb[10].mxu0  ;;  %v1228_v60 = vpop.f32.mrb[10].mxu1  ;;  %v408_v28 = vmax.f32 %v346_v32, 0.0  ;;  %v1459_v52 = vpack.c.bf16 %v708_v51, %v707_v50  ;;  %v1880_v53 = vld [vmem:[%s1967_s4 + $0x1] ss:$0 sm:$0xff] }
  0xf0   :  { %v281_v58 = vadd.f32 %v1204_v56, %v1816_v16  ;;  %v275_v59 = vpop.f32.mrb[11].mxu0  ;;  %v355_v62 = vpop.f32.mrb[11].mxu1  ;;  %v361_v41 = vadd.f32 %v1228_v60, %v1816_v16 }
  0xf1   :  { %v276_v61 = vadd.f32 %v1816_v16, %v275_v59  ;;  %1279 = vmatprep.mubr.f32.mxu1 %v392_v55  ;;  %v356_v35 = vadd.f32 %v1816_v16, %v355_v62  ;;  %1460 = vmatprep.subr.bf16.mxu0 %v1459_v52 }
  0xf2   :  { %1280 = vmatmul.mubr.f32.gmra.mrb[24].mxu1 %v393_v57  ;;  %v395_v1 = vmax.f32 %v281_v58, 0.0  ;;  %v411_v44 = vmax.f32 %v361_v41, 0.0  ;;  %1462 = vmatpush3.bf16.msra.mxu0 %v1459_v52 }
  0xf3   :  { %v394_v63 = vmax.f32 %v276_v61, 0.0  ;;  %v1207_v0 = vpop.f32.mrb[12].mxu0  ;;  %v1231_v4 = vpop.f32.mrb[12].mxu1  ;;  %v410_v36 = vmax.f32 %v356_v35, 0.0 }
  0xf4   :  { %v291_v2 = vadd.f32 %v1207_v0, %v1816_v16  ;;  %v285_v3 = vpop.f32.mrb[13].mxu0  ;;  %v365_v6 = vpop.f32.mrb[13].mxu1  ;;  %v371_v45 = vadd.f32 %v1231_v4, %v1816_v16 }
  0xf5   :  { %v286_v5 = vadd.f32 %v1816_v16, %v285_v3  ;;  %1282 = vmatprep.mubr.f32.mxu1 %v394_v63  ;;  %v366_v39 = vadd.f32 %v1816_v16, %v365_v6 }
  0xf6   :  { %1283 = vmatmul.mubr.f32.gmra.mrb[26].mxu1 %v395_v1  ;;  %v397_v10 = vmax.f32 %v291_v2, 0.0  ;;  %v413_v47 = vmax.f32 %v371_v45, 0.0 }
  0xf7   :  { %v396_v7 = vmax.f32 %v286_v5, 0.0  ;;  %v1210_v8 = vpop.f32.mrb[14].mxu0  ;;  %v1234_v13 = vpop.f32.mrb[14].mxu1  ;;  %v412_v42 = vmax.f32 %v366_v39, 0.0 }
  0xf8   :  { %v301_v11 = vadd.f32 %v1210_v8, %v1816_v16  ;;  %v295_v12 = vpop.f32.mrb[15].mxu0  ;;  %v375_v15 = vpop.f32.mrb[15].mxu1  ;;  %v381_v48 = vadd.f32 %v1234_v13, %v1816_v16 }
  0xf9   :  { %v296_v14 = vadd.f32 %v1816_v16, %v295_v12  ;;  %1285 = vmatprep.mubr.f32.mxu1 %v396_v7  ;;  %v376_v43 = vadd.f32 %v1816_v16, %v375_v15 }
  0xfa   :  { %1286 = vmatmul.mubr.f32.gmra.mrb[28].mxu1 %v397_v10  ;;  %v399_v21 = vmax.f32 %v301_v11, 0.0  ;;  %v415_v49 = vmax.f32 %v381_v48, 0.0 }
  0xfb   :  { %v398_v17 = vmax.f32 %v296_v14, 0.0  ;;  %v414_v46 = vmax.f32 %v376_v43, 0.0 }
  0xfd   :  { %1288 = vmatprep.mubr.f32.mxu1 %v398_v17 }
  0xfe   :  { %1289 = vmatmul.mubr.f32.gmra.mrb[30].mxu1 %v399_v21 }
  0xff   :  { %1291 = vmatprep.mubr.f32.mxu1 %v400_v18 }
 0x102   :  { %1292 = vmatmul.mubr.f32.gmra.mrb[32].mxu1 %v401_v25 }
 0x103   :  { %1294 = vmatprep.mubr.f32.mxu1 %v402_v22 }
 0x106   :  { %1295 = vmatmul.mubr.f32.gmra.mrb[34].mxu1 %v403_v30 }
 0x107   :  { %1297 = vmatprep.mubr.f32.mxu1 %v404_v27 }
 0x10a   :  { %1298 = vmatmul.mubr.f32.gmra.mrb[36].mxu1 %v405_v33 }
 0x10b   :  { %1300 = vmatprep.mubr.f32.mxu1 %v406_v20 }
 0x10e   :  { %1301 = vmatmul.mubr.f32.gmra.mrb[38].mxu1 %v407_v37 }
 0x10f   :  { %1303 = vmatprep.mubr.f32.mxu1 %v408_v28 }
 0x112   :  { %1304 = vmatmul.mubr.f32.gmra.mrb[40].mxu1 %v409_v40 }
 0x113   :  { %1306 = vmatprep.mubr.f32.mxu1 %v410_v36 }
 0x116   :  { %1307 = vmatmul.mubr.f32.gmra.mrb[42].mxu1 %v411_v44 }
 0x117   :  { %1309 = vmatprep.mubr.f32.mxu1 %v412_v42 }
 0x11a   :  { %1310 = vmatmul.mubr.f32.gmra.mrb[44].mxu1 %v413_v47 }
 0x11b   :  { %1312 = vmatprep.mubr.f32.mxu1 %v414_v46 }
 0x11e   :  { %1313 = vmatmul.mubr.f32.gmra.mrb[46].mxu1 %v415_v49 }
 0x1b5   :  { %v1269_v16 = vpop.f32.mrb[16].mxu1 }
 0x1b6   :  { %v508_v54 = vadd.f32 %v1269_v16, %v1880_v53  ;;  %v502_v55 = vpop.f32.mrb[17].mxu1 }
 0x1b7   :  { %v503_v56 = vadd.f32 %v1880_v53, %v502_v55 }
 0x1b8   :  { %v662_v59 = vmax.f32 %v508_v54, 0.0 }
 0x1b9   :  { %v661_v57 = vmax.f32 %v503_v56, 0.0  ;;  %v1272_v58 = vpop.f32.mrb[18].mxu1 }
 0x1ba   :  { %v518_v60 = vadd.f32 %v1272_v58, %v1880_v53  ;;  %v512_v61 = vpop.f32.mrb[19].mxu1 }
 0x1bb   :  { %v513_v62 = vadd.f32 %v1880_v53, %v512_v61  ;;  %1347 = vmatprep.mubr.f32.mxu0 %v661_v57 }
 0x1bc   :  { %1348 = vmatmul.mubr.f32.vlgmr.msra.gmra.mrb[16].mxu0 %v662_v59  ;;  %v664_v1 = vmax.f32 %v518_v60, 0.0 }
 0x1bd   :  { %v663_v63 = vmax.f32 %v513_v62, 0.0  ;;  %v1275_v0 = vpop.f32.mrb[20].mxu1 }
 0x1be   :  { %v528_v2 = vadd.f32 %v1275_v0, %v1880_v53  ;;  %v522_v3 = vpop.f32.mrb[21].mxu1 }
 0x1bf   :  { %v523_v4 = vadd.f32 %v1880_v53, %v522_v3  ;;  %1350 = vmatprep.mubr.f32.mxu0 %v663_v63 }
 0x1c0   :  { %1351 = vmatmul.mubr.f32.gmra.mrb[18].mxu0 %v664_v1  ;;  %v666_v7 = vmax.f32 %v528_v2, 0.0 }
 0x1c1   :  { %v665_v5 = vmax.f32 %v523_v4, 0.0  ;;  %v1278_v6 = vpop.f32.mrb[22].mxu1 }
 0x1c2   :  { %v538_v8 = vadd.f32 %v1278_v6, %v1880_v53  ;;  %v532_v9 = vpop.f32.mrb[23].mxu1 }
 0x1c3   :  { %v533_v10 = vadd.f32 %v1880_v53, %v532_v9  ;;  %1353 = vmatprep.mubr.f32.mxu0 %v665_v5 }
 0x1c4   :  { %1354 = vmatmul.mubr.f32.gmra.mrb[20].mxu0 %v666_v7  ;;  %v668_v13 = vmax.f32 %v538_v8, 0.0 }
 0x1c5   :  { %v667_v11 = vmax.f32 %v533_v10, 0.0  ;;  %v1281_v12 = vpop.f32.mrb[24].mxu1 }
 0x1c6   :  { %v548_v14 = vadd.f32 %v1281_v12, %v1880_v53  ;;  %v542_v15 = vpop.f32.mrb[25].mxu1 }
 0x1c7   :  { %v543_v17 = vadd.f32 %v1880_v53, %v542_v15  ;;  %1356 = vmatprep.mubr.f32.mxu0 %v667_v11 }
 0x1c8   :  { %1357 = vmatmul.mubr.f32.gmra.mrb[22].mxu0 %v668_v13  ;;  %v670_v21 = vmax.f32 %v548_v14, 0.0 }
 0x1c9   :  { %v669_v18 = vmax.f32 %v543_v17, 0.0  ;;  %v1284_v19 = vpop.f32.mrb[26].mxu1 }
 0x1ca   :  { %v558_v23 = vadd.f32 %v1284_v19, %v1880_v53  ;;  %v552_v22 = vpop.f32.mrb[27].mxu1 }
 0x1cb   :  { %v553_v24 = vadd.f32 %v1880_v53, %v552_v22  ;;  %1359 = vmatprep.mubr.f32.mxu0 %v669_v18 }
 0x1cc   :  { %1360 = vmatmul.mubr.f32.gmra.mrb[24].mxu0 %v670_v21  ;;  %v672_v27 = vmax.f32 %v558_v23, 0.0 }
 0x1cd   :  { %v671_v25 = vmax.f32 %v553_v24, 0.0  ;;  %v1287_v26 = vpop.f32.mrb[28].mxu1  ;;  %v1917_v24 = vld [vmem:[%s1967_s4 + $0x2] ss:$0 sm:$0xff]  ;;  %s1556_s4 = smov [#allocation2]  }
 0x1ce   :  { %v568_v29 = vadd.f32 %v1287_v26, %v1880_v53  ;;  %v562_v30 = vpop.f32.mrb[29].mxu1  ;;  %s1007_s21 = sshll.u32 %s1556_s4, 4  ;;  %s1008_s21 = int_to_ptr.vmem [resolvable:$true] %s1007_s21 }
 0x1cf   :  { %v563_v31 = vadd.f32 %v1880_v53, %v562_v30  ;;  %1362 = vmatprep.mubr.f32.mxu0 %v671_v25  ;;  %s1532_s22 = scalar_lea.vmem %s1008_s21, 4096  ;;  %p1537_p1 = scmp.lt.s32.totalorder %s1008_s21, %s1008_s21 }
 0x1d0   :  { %1363 = vmatmul.mubr.f32.gmra.mrb[26].mxu0 %v672_v27  ;;  %v674_v33 = vmax.f32 %v568_v29, 0.0  ;;  %p1533_p0 = scmp.ne.s32.totalorder %s1008_s21, %s1532_s22  ;;  %p1538_p2 = scmp.lt.s32.totalorder %s1532_s22, %s1532_s22 }
 0x1d1   :  { %v673_v20 = vmax.f32 %v563_v31, 0.0  ;;  %v1290_v32 = vpop.f32.mrb[30].mxu1 }
 0x1d2   :  { %v578_v34 = vadd.f32 %v1290_v32, %v1880_v53  ;;  %v572_v28 = vpop.f32.mrb[31].mxu1  ;;  %p1539_p3 = por %p1538_p2, %p1537_p1 }
 0x1d3   :  { %v573_v35 = vadd.f32 %v1880_v53, %v572_v28  ;;  %1365 = vmatprep.mubr.f32.mxu0 %v673_v20 }
 0x1d4   :  { %1366 = vmatmul.mubr.f32.gmra.mrb[28].mxu0 %v674_v33  ;;  %v676_v36 = vmax.f32 %v578_v34, 0.0  ;;  %p1540_p4 = pnand %p1539_p3, %p1533_p0 }
 0x1d5   :  { %v675_v37 = vmax.f32 %v573_v35, 0.0  ;;  %v1293_v38 = vpop.f32.mrb[32].mxu1 }
 0x1d6   :  { %v588_v39 = vadd.f32 %v1293_v38, %v1880_v53  ;;  %v582_v40 = vpop.f32.mrb[33].mxu1 }
 0x1d7   :  { %v583_v41 = vadd.f32 %v1880_v53, %v582_v40  ;;  %1368 = vmatprep.mubr.f32.mxu0 %v675_v37 }
 0x1d8   :  { %1369 = vmatmul.mubr.f32.gmra.mrb[30].mxu0 %v676_v36  ;;  %v678_v44 = vmax.f32 %v588_v39, 0.0 }
 0x1d9   :  { %v677_v42 = vmax.f32 %v583_v41, 0.0  ;;  %v1296_v43 = vpop.f32.mrb[34].mxu1 }
 0x1da   :  { %v598_v45 = vadd.f32 %v1296_v43, %v1880_v53  ;;  %v592_v46 = vpop.f32.mrb[35].mxu1 }
 0x1db   :  { %v593_v47 = vadd.f32 %v1880_v53, %v592_v46  ;;  %1371 = vmatprep.mubr.f32.mxu0 %v677_v42 }
 0x1dc   :  { %1372 = vmatmul.mubr.f32.gmra.mrb[32].mxu0 %v678_v44  ;;  %v680_v50 = vmax.f32 %v598_v45, 0.0 }
 0x1dd   :  { %v679_v48 = vmax.f32 %v593_v47, 0.0  ;;  %v1299_v49 = vpop.f32.mrb[36].mxu1 }
 0x1de   :  { %v608_v51 = vadd.f32 %v1299_v49, %v1880_v53  ;;  %v602_v52 = vpop.f32.mrb[37].mxu1 }
 0x1df   :  { %v603_v16 = vadd.f32 %v1880_v53, %v602_v52  ;;  %1374 = vmatprep.mubr.f32.mxu0 %v679_v48 }
 0x1e0   :  { %1375 = vmatmul.mubr.f32.gmra.mrb[34].mxu0 %v680_v50  ;;  %v682_v56 = vmax.f32 %v608_v51, 0.0 }
 0x1e1   :  { %v681_v54 = vmax.f32 %v603_v16, 0.0  ;;  %v1302_v55 = vpop.f32.mrb[38].mxu1 }
 0x1e2   :  { %v618_v57 = vadd.f32 %v1302_v55, %v1880_v53  ;;  %v612_v58 = vpop.f32.mrb[39].mxu1 }
 0x1e3   :  { %v613_v59 = vadd.f32 %v1880_v53, %v612_v58  ;;  %1377 = vmatprep.mubr.f32.mxu0 %v681_v54 }
 0x1e4   :  { %1378 = vmatmul.mubr.f32.gmra.mrb[36].mxu0 %v682_v56  ;;  %v684_v62 = vmax.f32 %v618_v57, 0.0 }
 0x1e5   :  { %v683_v60 = vmax.f32 %v613_v59, 0.0  ;;  %v1305_v61 = vpop.f32.mrb[40].mxu1 }
 0x1e6   :  { %v628_v63 = vadd.f32 %v1305_v61, %v1880_v53  ;;  %v622_v0 = vpop.f32.mrb[41].mxu1 }
 0x1e7   :  { %v623_v1 = vadd.f32 %v1880_v53, %v622_v0  ;;  %1380 = vmatprep.mubr.f32.mxu0 %v683_v60 }
 0x1e8   :  { %1381 = vmatmul.mubr.f32.gmra.mrb[38].mxu0 %v684_v62  ;;  %v686_v4 = vmax.f32 %v628_v63, 0.0 }
 0x1e9   :  { %v685_v2 = vmax.f32 %v623_v1, 0.0  ;;  %v1308_v3 = vpop.f32.mrb[42].mxu1 }
 0x1ea   :  { %v638_v5 = vadd.f32 %v1308_v3, %v1880_v53  ;;  %v632_v6 = vpop.f32.mrb[43].mxu1 }
 0x1eb   :  { %v633_v7 = vadd.f32 %v1880_v53, %v632_v6  ;;  %1383 = vmatprep.mubr.f32.mxu0 %v685_v2 }
 0x1ec   :  { %1384 = vmatmul.mubr.f32.gmra.mrb[40].mxu0 %v686_v4  ;;  %v688_v10 = vmax.f32 %v638_v5, 0.0 }
 0x1ed   :  { %v687_v8 = vmax.f32 %v633_v7, 0.0  ;;  %v1311_v9 = vpop.f32.mrb[44].mxu1 }
 0x1ee   :  { %v648_v11 = vadd.f32 %v1311_v9, %v1880_v53  ;;  %v642_v12 = vpop.f32.mrb[45].mxu1 }
 0x1ef   :  { %v643_v13 = vadd.f32 %v1880_v53, %v642_v12  ;;  %1386 = vmatprep.mubr.f32.mxu0 %v687_v8 }
 0x1f0   :  { %1387 = vmatmul.mubr.f32.gmra.mrb[42].mxu0 %v688_v10  ;;  %v690_v17 = vmax.f32 %v648_v11, 0.0 }
 0x1f1   :  { %v689_v14 = vmax.f32 %v643_v13, 0.0  ;;  %v1314_v15 = vpop.f32.mrb[46].mxu1 }
 0x1f2   :  { %v658_v18 = vadd.f32 %v1314_v15, %v1880_v53  ;;  %v652_v19 = vpop.f32.mrb[47].mxu1 }
 0x1f3   :  { %v653_v21 = vadd.f32 %v1880_v53, %v652_v19  ;;  %1389 = vmatprep.mubr.f32.mxu0 %v689_v14 }
 0x1f4   :  { %1390 = vmatmul.mubr.f32.gmra.mrb[44].mxu0 %v690_v17  ;;  %v692_v22 = vmax.f32 %v658_v18, 0.0 }
 0x1f5   :  { %v691_v23 = vmax.f32 %v653_v21, 0.0 }
 0x1f7   :  { %1392 = vmatprep.mubr.f32.mxu0 %v691_v23 }
 0x1f8   :  { %1393 = vmatmul.mubr.f32.gmra.mrb[46].mxu0 %v692_v22 }
 0x28f   :  { %v1349_v25 = vpop.f32.mrb[16].mxu0 }
 0x290   :  { %v785_v26 = vadd.f32 %v1349_v25, %v1917_v24  ;;  %v779_v27 = vpop.f32.mrb[17].mxu0 }
 0x291   :  { %v780_v29 = vadd.f32 %v1917_v24, %v779_v27 }
 0x292   :  { %1468 = vtanh.f32 %v785_v26 }
 0x293   :  { %1470 = vtanh.f32 %v780_v29  ;;  %v1352_v53 = vpop.f32.mrb[18].mxu0 }
 0x294   :  { %v795_v30 = vadd.f32 %v1352_v53, %v1917_v24  ;;  %v789_v31 = vpop.f32.mrb[19].mxu0 }
 0x295   :  { %v790_v20 = vadd.f32 %v1917_v24, %v789_v31 }
 0x296   :  { %1472 = vtanh.f32 %v795_v30 }
 0x297   :  { %1474 = vtanh.f32 %v790_v20  ;;  %v1355_v32 = vpop.f32.mrb[20].mxu0 }
 0x298   :  { %v805_v33 = vadd.f32 %v1355_v32, %v1917_v24  ;;  %v799_v34 = vpop.f32.mrb[21].mxu0 }
 0x299   :  { %v800_v28 = vadd.f32 %v1917_v24, %v799_v34 }
 0x29a   :  { %1476 = vtanh.f32 %v805_v33 }
 0x29b   :  { %1478 = vtanh.f32 %v800_v28  ;;  %v1358_v35 = vpop.f32.mrb[22].mxu0 }
 0x29c   :  { %v1469_v37 = vpop.eup %1468  ;;  %v815_v38 = vadd.f32 %v1358_v35, %v1917_v24  ;;  %v809_v36 = vpop.f32.mrb[23].mxu0 }
 0x29d   :  { %v1471_v39 = vpop.eup %1470  ;;  %971 = vst [vmem:[#allocation2 + $0x8] sm:$0xff] %v1469_v37  ;;  %v810_v40 = vadd.f32 %v1917_v24, %v809_v36 }
 0x29e   :  { %970 = vst [vmem:[#allocation2] sm:$0xff] %v1471_v39  ;;  %1480 = vtanh.f32 %v815_v38 }
 0x29f   :  { %1482 = vtanh.f32 %v810_v40  ;;  %v1361_v41 = vpop.f32.mrb[24].mxu0 }
 0x2a0   :  { %v1473_v42 = vpop.eup %1472  ;;  %v825_v43 = vadd.f32 %v1361_v41, %v1917_v24  ;;  %v819_v44 = vpop.f32.mrb[25].mxu0 }
 0x2a1   :  { %v1475_v45 = vpop.eup %1474  ;;  %973 = vst [vmem:[#allocation2 + $0x18] sm:$0xff] %v1473_v42  ;;  %v820_v46 = vadd.f32 %v1917_v24, %v819_v44 }
 0x2a2   :  { %972 = vst [vmem:[#allocation2 + $0x10] sm:$0xff] %v1475_v45  ;;  %1484 = vtanh.f32 %v825_v43 }
 0x2a3   :  { %1486 = vtanh.f32 %v820_v46  ;;  %v1364_v47 = vpop.f32.mrb[26].mxu0 }
 0x2a4   :  { %v1477_v48 = vpop.eup %1476  ;;  %v835_v49 = vadd.f32 %v1364_v47, %v1917_v24  ;;  %v829_v50 = vpop.f32.mrb[27].mxu0 }
 0x2a5   :  { %v1479_v51 = vpop.eup %1478  ;;  %975 = vst [vmem:[#allocation2 + $0x28] sm:$0xff] %v1477_v48  ;;  %v830_v52 = vadd.f32 %v1917_v24, %v829_v50 }
 0x2a6   :  { %974 = vst [vmem:[#allocation2 + $0x20] sm:$0xff] %v1479_v51  ;;  %1488 = vtanh.f32 %v835_v49 }
 0x2a7   :  { %1490 = vtanh.f32 %v830_v52  ;;  %v1367_v16 = vpop.f32.mrb[28].mxu0 }
 0x2a8   :  { %v1481_v54 = vpop.eup %1480  ;;  %v845_v55 = vadd.f32 %v1367_v16, %v1917_v24  ;;  %v839_v56 = vpop.f32.mrb[29].mxu0 }
 0x2a9   :  { %v1483_v57 = vpop.eup %1482  ;;  %977 = vst [vmem:[#allocation2 + $0x38] sm:$0xff] %v1481_v54  ;;  %v840_v58 = vadd.f32 %v1917_v24, %v839_v56 }
 0x2aa   :  { %976 = vst [vmem:[#allocation2 + $0x30] sm:$0xff] %v1483_v57  ;;  %1492 = vtanh.f32 %v845_v55 }
 0x2ab   :  { %1494 = vtanh.f32 %v840_v58  ;;  %v1370_v59 = vpop.f32.mrb[30].mxu0 }
 0x2ac   :  { %v1485_v60 = vpop.eup %1484  ;;  %v855_v61 = vadd.f32 %v1370_v59, %v1917_v24  ;;  %v849_v62 = vpop.f32.mrb[31].mxu0 }
 0x2ad   :  { %v1487_v63 = vpop.eup %1486  ;;  %979 = vst [vmem:[#allocation2 + $0x48] sm:$0xff] %v1485_v60  ;;  %v850_v0 = vadd.f32 %v1917_v24, %v849_v62 }
 0x2ae   :  { %978 = vst [vmem:[#allocation2 + $0x40] sm:$0xff] %v1487_v63  ;;  %1496 = vtanh.f32 %v855_v61 }
 0x2af   :  { %1498 = vtanh.f32 %v850_v0  ;;  %v1373_v1 = vpop.f32.mrb[32].mxu0 }
 0x2b0   :  { %v1489_v2 = vpop.eup %1488  ;;  %v865_v3 = vadd.f32 %v1373_v1, %v1917_v24  ;;  %v859_v4 = vpop.f32.mrb[33].mxu0 }
 0x2b1   :  { %v1491_v5 = vpop.eup %1490  ;;  %981 = vst [vmem:[#allocation2 + $0x58] sm:$0xff] %v1489_v2  ;;  %v860_v6 = vadd.f32 %v1917_v24, %v859_v4 }
 0x2b2   :  { %980 = vst [vmem:[#allocation2 + $0x50] sm:$0xff] %v1491_v5  ;;  %1500 = vtanh.f32 %v865_v3 }
 0x2b3   :  { %1502 = vtanh.f32 %v860_v6  ;;  %v1376_v7 = vpop.f32.mrb[34].mxu0 }
 0x2b4   :  { %v1493_v8 = vpop.eup %1492  ;;  %v875_v9 = vadd.f32 %v1376_v7, %v1917_v24  ;;  %v869_v10 = vpop.f32.mrb[35].mxu0 }
 0x2b5   :  { %v1495_v11 = vpop.eup %1494  ;;  %983 = vst [vmem:[#allocation2 + $0x68] sm:$0xff] %v1493_v8  ;;  %v870_v12 = vadd.f32 %v1917_v24, %v869_v10 }
 0x2b6   :  { %982 = vst [vmem:[#allocation2 + $0x60] sm:$0xff] %v1495_v11  ;;  %1504 = vtanh.f32 %v875_v9 }
 0x2b7   :  { %1506 = vtanh.f32 %v870_v12  ;;  %v1379_v13 = vpop.f32.mrb[36].mxu0 }
 0x2b8   :  { %v1497_v14 = vpop.eup %1496  ;;  %v885_v15 = vadd.f32 %v1379_v13, %v1917_v24  ;;  %v879_v17 = vpop.f32.mrb[37].mxu0 }
 0x2b9   :  { %v1499_v18 = vpop.eup %1498  ;;  %985 = vst [vmem:[#allocation2 + $0x78] sm:$0xff] %v1497_v14  ;;  %v880_v19 = vadd.f32 %v1917_v24, %v879_v17 }
 0x2ba   :  { %984 = vst [vmem:[#allocation2 + $0x70] sm:$0xff] %v1499_v18  ;;  %1508 = vtanh.f32 %v885_v15 }
 0x2bb   :  { %1510 = vtanh.f32 %v880_v19  ;;  %v1382_v21 = vpop.f32.mrb[38].mxu0 }
 0x2bc   :  { %v1501_v23 = vpop.eup %1500  ;;  %v895_v22 = vadd.f32 %v1382_v21, %v1917_v24  ;;  %v889_v25 = vpop.f32.mrb[39].mxu0 }
 0x2bd   :  { %v1503_v26 = vpop.eup %1502  ;;  %987 = vst [vmem:[#allocation2 + $0x88] sm:$0xff] %v1501_v23  ;;  %v890_v27 = vadd.f32 %v1917_v24, %v889_v25 }
 0x2be   :  { %986 = vst [vmem:[#allocation2 + $0x80] sm:$0xff] %v1503_v26  ;;  %1512 = vtanh.f32 %v895_v22 }
 0x2bf   :  { %1514 = vtanh.f32 %v890_v27  ;;  %v1385_v29 = vpop.f32.mrb[40].mxu0 }
 0x2c0   :  { %v1505_v53 = vpop.eup %1504  ;;  %v905_v30 = vadd.f32 %v1385_v29, %v1917_v24  ;;  %v899_v31 = vpop.f32.mrb[41].mxu0 }
 0x2c1   :  { %v1507_v20 = vpop.eup %1506  ;;  %989 = vst [vmem:[#allocation2 + $0x98] sm:$0xff] %v1505_v53  ;;  %v900_v32 = vadd.f32 %v1917_v24, %v899_v31 }
 0x2c2   :  { %988 = vst [vmem:[#allocation2 + $0x90] sm:$0xff] %v1507_v20  ;;  %1516 = vtanh.f32 %v905_v30 }
 0x2c3   :  { %1518 = vtanh.f32 %v900_v32  ;;  %v1388_v33 = vpop.f32.mrb[42].mxu0 }
 0x2c4   :  { %v1509_v34 = vpop.eup %1508  ;;  %v915_v28 = vadd.f32 %v1388_v33, %v1917_v24  ;;  %v909_v35 = vpop.f32.mrb[43].mxu0 }
 0x2c5   :  { %v1511_v37 = vpop.eup %1510  ;;  %991 = vst [vmem:[#allocation2 + $0xa8] sm:$0xff] %v1509_v34  ;;  %v910_v38 = vadd.f32 %v1917_v24, %v909_v35 }
 0x2c6   :  { %990 = vst [vmem:[#allocation2 + $0xa0] sm:$0xff] %v1511_v37  ;;  %1520 = vtanh.f32 %v915_v28 }
 0x2c7   :  { %1522 = vtanh.f32 %v910_v38  ;;  %v1391_v36 = vpop.f32.mrb[44].mxu0 }
 0x2c8   :  { %v1513_v39 = vpop.eup %1512  ;;  %v925_v40 = vadd.f32 %v1391_v36, %v1917_v24  ;;  %v919_v41 = vpop.f32.mrb[45].mxu0 }
 0x2c9   :  { %v1515_v42 = vpop.eup %1514  ;;  %993 = vst [vmem:[#allocation2 + $0xb8] sm:$0xff] %v1513_v39  ;;  %v920_v43 = vadd.f32 %v1917_v24, %v919_v41 }
 0x2ca   :  { %992 = vst [vmem:[#allocation2 + $0xb0] sm:$0xff] %v1515_v42  ;;  %1524 = vtanh.f32 %v925_v40 }
 0x2cb   :  { %1526 = vtanh.f32 %v920_v43  ;;  %v1394_v44 = vpop.f32.mrb[46].mxu0 }
 0x2cc   :  { %v1517_v45 = vpop.eup %1516  ;;  %v935_v46 = vadd.f32 %v1394_v44, %v1917_v24  ;;  %v929_v47 = vpop.f32.mrb[47].mxu0 }
 0x2cd   :  { %v1519_v48 = vpop.eup %1518  ;;  %995 = vst [vmem:[#allocation2 + $0xc8] sm:$0xff] %v1517_v45  ;;  %v930_v49 = vadd.f32 %v1917_v24, %v929_v47 }
 0x2ce   :  { %994 = vst [vmem:[#allocation2 + $0xc0] sm:$0xff] %v1519_v48  ;;  %1528 = vtanh.f32 %v935_v46 }
 0x2cf   :  { %1530 = vtanh.f32 %v930_v49 }
 0x2d0   :  { %v1521_v50 = vpop.eup %1520 }
 0x2d1   :  { %v1523_v51 = vpop.eup %1522  ;;  %997 = vst [vmem:[#allocation2 + $0xd8] sm:$0xff] %v1521_v50 }
 0x2d2   :  { %996 = vst [vmem:[#allocation2 + $0xd0] sm:$0xff] %v1523_v51 }
 0x2d4   :  { %v1525_v52 = vpop.eup %1524 }
 0x2d5   :  { %v1527_v16 = vpop.eup %1526  ;;  %999 = vst [vmem:[#allocation2 + $0xe8] sm:$0xff] %v1525_v52 }
 0x2d6   :  { %998 = vst [vmem:[#allocation2 + $0xe0] sm:$0xff] %v1527_v16 }
 0x2d8   :  { %v1529_v54 = vpop.eup %1528 }
 0x2d9   :  { %v1531_v55 = vpop.eup %1530  ;;  %1001 = vst [vmem:[#allocation2 + $0xf8] sm:$0xff] %v1529_v54 }
 0x2da   :  { %1000 = vst [vmem:[#allocation2 + $0xf0] sm:$0xff] %v1531_v55 }
 0x2db   :  { %1543 = shalt.err (!%p1540_p4)
}
 0x2dc   :  { %s1544_s25 = scalar_lea.hbm %s1968_s5, 4096 }
 0x2dd   :  { %p1545_p5 = scmp.ne.s32.totalorder %s1968_s5, %s1544_s25  ;;  %p1548_p6 = scmp.lt.u32.totalorder %s1544_s25, %s1968_s5 }
 0x2df   :  { %p1550_p7 = pnand %p1548_p6, %p1545_p5 }
 0x2e1   :  { %1553 = shalt.err (!%p1550_p7)
}
 0x2e2   :  { %s1557_s29 = smov 128   ;;  %s1558_s30 = smov 8  }
 0x2e3   :  { %1013 = dma.vmem_to_hbm [thread:$0]  %s1008_s21, 4096, %s1968_s5, [#allocation3], %s1557_s29, %s1557_s29, %s1558_s30  }
 0x2e4   :  { %1554 = dma.done.wait [#allocation3], 4096  }
 0x2e5   :  { %1555 = vsyncadd [#allocation3], 4294963200 }
 0x2e6   :  { %1017 = vsyncpa [#allocation3], 1 }

</bundles_post_ra>
